<compile_context>
chip_gen: v7x
topology: tpu7x:2x2x1
jax: 0.10.0
libtpu: 0.0.40
codegen_flags: <defaults>
</compile_context>

<pallas_src>
import functools

import jax
import jax.numpy as jnp
from jax.experimental import pallas as pl
from jax.experimental.pallas import tpu as pltpu

EPS = 1e-5


def _round_up(x, m):
    return (x + m - 1) // m * m


def _conv_stats_kernel(patches_ref, w_ref, gamma_ref, beta_ref,
                       y_ref, ss_ref, sum_ref, sq_ref, *, cout, m_actual):
    """Phase 1: conv tile on the MXU + global per-channel sum / sum-of-squares."""
    step = pl.program_id(0)

    @pl.when(step == 0)
    def _():
        sum_ref[...] = jnp.zeros_like(sum_ref)
        sq_ref[...] = jnp.zeros_like(sq_ref)

    # bf16 x bf16 -> f32 accumulate on the MXU.  No conv bias (cancels under BN).
    y = jnp.dot(patches_ref[...], w_ref[...], preferred_element_type=jnp.float32)

    # Single-pass statistics: E[y^2] - E[y]^2, f32 accumulators.  Padded rows of
    # the im2col matrix are all-zero so they contribute exactly zero to both sums.
    sum_ref[...] += jnp.sum(y, axis=0, keepdims=True)
    sq_ref[...] += jnp.sum(y * y, axis=0, keepdims=True)

    # Only write the real Cout lanes to HBM (avoids 16x padded write traffic).
    y_ref[...] = y[:, :cout]

    @pl.when(step == pl.num_programs(0) - 1)
    def _():
        inv_m = jnp.float32(1.0 / m_actual)
        mean = sum_ref[...] * inv_m
        var = sq_ref[...] * inv_m - mean * mean
        scale = gamma_ref[...] * jax.lax.rsqrt(var + EPS)
        shift = beta_ref[...] - mean * scale
        ss_ref[...] = jnp.concatenate([scale, shift], axis=0)


def _bn_relu_kernel(ss_ref, y_ref, out_ref, *, cout):
    """Phase 2: fused per-channel y*scale + shift, then ReLU (one VPU pass)."""
    ss = ss_ref[...]
    scale = ss[0:1, :cout]
    shift = ss[1:2, :cout]
    out_ref[...] = jnp.maximum(y_ref[...] * scale + shift, jnp.float32(0.0))


def _im2col_s2_k3_p1(x):
    """x: (N, C, H, W) -> patches (N*OH*OW, C*9), rows ordered (n, oh, ow)."""
    n, c, h, w = x.shape
    oh, ow = (h + 2 - 3) // 2 + 1, (w + 2 - 3) // 2 + 1
    xp = jnp.pad(x, ((0, 0), (0, 0), (1, 1), (1, 1)))
    cols = []
    for kh in range(3):
        for kw in range(3):
            cols.append(xp[:, :, kh:kh + 2 * oh:2, kw:kw + 2 * ow:2])  # (N,C,OH,OW)
    p = jnp.stack(cols, axis=0).reshape(3, 3, n, c, oh, ow)
    # -> (N, OH, OW, C, KH, KW) -> (N*OH*OW, C*9); columns ordered (cin, kh, kw)
    p = p.transpose(2, 4, 5, 3, 0, 1).reshape(n * oh * ow, c * 9)
    return p, oh, ow


@jax.jit
def block_forward(x, conv_w, conv_b, bn_gamma, bn_beta):
    """x: (N, Cin, H, W) f32 NCHW.  Returns (N, Cout, OH, OW) f32.

    conv_b is accepted for interface parity with nn.Conv2d but is unused: with
    training-mode BatchNorm right after the conv the bias cancels exactly.
    """
    del conv_b
    n, cin, h, w = x.shape
    cout = conv_w.shape[0]

    patches, oh, ow = _im2col_s2_k3_p1(x)                 # (M, K) f32
    m, k = patches.shape

    # Row tiling: M axis is pipelined (phase 1) / megacore-shared (phase 2).
    # 512-row f32/bf16 tiles stay far below the v7x 64 MiB VMEM budget.
    tile_m = min(512, _round_up(m, 8))
    m_p = _round_up(m, tile_m)
    cp = _round_up(cout, 128)                             # lane width for MXU/VPU

    # bf16 operands for the matmul (f32 accumulation inside the kernel).
    patches_p = jnp.pad(patches, ((0, m_p - m), (0, 0))).astype(jnp.bfloat16)
    wf = conv_w.reshape(cout, cin * 9).T                  # (K, Cout), (cin,kh,kw) order
    wf_p = jnp.pad(wf, ((0, 0), (0, cp - cout))).astype(jnp.bfloat16)
    g_p = jnp.pad(bn_gamma, (0, cp - cout)).reshape(1, cp).astype(jnp.float32)
    be_p = jnp.pad(bn_beta, (0, cp - cout)).reshape(1, cp).astype(jnp.float32)

    grid = (m_p // tile_m,)

    # Phase 1: conv + global BN statistics -> fused (scale, shift).
    y_inter, ss = pl.pallas_call(
        functools.partial(_conv_stats_kernel, cout=cout, m_actual=m),
        out_shape=(jax.ShapeDtypeStruct((m_p, cout), jnp.float32),
                   jax.ShapeDtypeStruct((2, cp), jnp.float32)),
        grid=grid,
        in_specs=[
            pl.BlockSpec((tile_m, k), lambda i: (i, 0)),
            pl.BlockSpec((k, cp), lambda i: (0, 0)),
            pl.BlockSpec((1, cp), lambda i: (0, 0)),
            pl.BlockSpec((1, cp), lambda i: (0, 0)),
        ],
        out_specs=(pl.BlockSpec((tile_m, cout), lambda i: (i, 0)),
                   pl.BlockSpec((2, cp), lambda i: (0, 0))),
        scratch_shapes=[pltpu.VMEM((1, cp), jnp.float32),
                        pltpu.VMEM((1, cp), jnp.float32)],
        compiler_params=pltpu.CompilerParams(
            dimension_semantics=("arbitrary",),
            vmem_limit_bytes=32 * 1024 * 1024),
    )(patches_p, wf_p, g_p, be_p)

    # Phase 2: fused BN affine + ReLU, in place on the intermediate buffer.
    out_flat = pl.pallas_call(
        functools.partial(_bn_relu_kernel, cout=cout),
        out_shape=jax.ShapeDtypeStruct((m_p, cout), jnp.float32),
        grid=grid,
        in_specs=[
            pl.BlockSpec((2, cp), lambda i: (0, 0)),
            pl.BlockSpec((tile_m, cout), lambda i: (i, 0)),
        ],
        out_specs=pl.BlockSpec((tile_m, cout), lambda i: (i, 0)),
        input_output_aliases={1: 0},
        compiler_params=pltpu.CompilerParams(
            dimension_semantics=("parallel",),
            vmem_limit_bytes=32 * 1024 * 1024),
    )(ss, y_inter)

    out = out_flat[:m].reshape(n, oh, ow, cout).transpose(0, 3, 1, 2)  # -> NCHW
    return out


def _reference(x, conv_w, conv_b, bn_gamma, bn_beta):
    # Full-f32 reference of the PyTorch module (training-mode BatchNorm).
    y = jax.lax.conv_general_dilated(
        x, conv_w, window_strides=(2, 2), padding=((1, 1), (1, 1)),
        dimension_numbers=("NCHW", "OIHW", "NCHW"))
    y = y + conv_b[None, :, None, None]
    mean = y.mean(axis=(0, 2, 3), keepdims=True)
    var = ((y - mean) ** 2).mean(axis=(0, 2, 3), keepdims=True)
    y = (y - mean) / jnp.sqrt(var + EPS)
    y = y * bn_gamma[None, :, None, None] + bn_beta[None, :, None, None]
    return jnp.maximum(y, 0.0)


if __name__ == "__main__":
    key = jax.random.PRNGKey(0)
    k_x, k_w, k_b = jax.random.split(key, 3)

    N, CIN, COUT, H, W = 2, 4, 8, 16, 16
    x = jax.random.normal(k_x, (N, CIN, H, W), dtype=jnp.float32)

    # Deterministic synthetic parameters (shapes match nn.Conv2d / nn.BatchNorm2d).
    conv_w = 0.1 * jax.random.normal(k_w, (COUT, CIN, 3, 3), dtype=jnp.float32)
    conv_b = 0.05 * jax.random.normal(k_b, (COUT,), dtype=jnp.float32)
    bn_gamma = 1.0 + 0.1 * jnp.arange(COUT, dtype=jnp.float32)
    bn_beta = 0.02 * jnp.arange(COUT, dtype=jnp.float32)

    out = block_forward(x, conv_w, conv_b, bn_gamma, bn_beta)
    out = jax.block_until_ready(out)

    ref = _reference(x, conv_w, conv_b, bn_gamma, bn_beta)
    assert out.shape == (N, COUT, H // 2, W // 2), out.shape
    # Tolerance accounts for bf16 matmul operands (f32 accumulation) vs the
    # full-f32 reference; the bias-drop and fused BN are mathematically exact.
    assert jnp.allclose(out, ref, atol=3e-2, rtol=3e-2), float(jnp.max(jnp.abs(out - ref)))

    print("KERNEL_OK")
</pallas_src>

<mosaic_0001>
module attributes {stable_mosaic.version = 11 : i64} {
  func.func @_bn_relu_kernel(%arg0: i32, %arg1: memref<2x128xf32, #tpu.memory_space<vmem>>, %arg2: memref<128x8xf32, #tpu.memory_space<vmem>>, %arg3: memref<128x8xf32, #tpu.memory_space<vmem>>) attributes {dimension_semantics = [#tpu.dimension_semantics<parallel>], iteration_bounds = array<i64: 1>, scalar_prefetch = 0 : i64, scratch_operands = 0 : i64, tpu.core_type = #tpu.core_type<tc>, window_params = [{pipeline_mode = #tpu.pipeline_mode<synchronous>, transform_indices = @transform_0, window_bounds = array<i64: 2, 128>}, {transform_indices = @transform_1, window_bounds = array<i64: 128, 8>}, {transform_indices = @transform_2, window_bounds = array<i64: 128, 8>}]} {
    %c0 = arith.constant 0 : index
    %c0_0 = arith.constant 0 : index
    %0 = vector.load %arg1[%c0, %c0_0] : memref<2x128xf32, #tpu.memory_space<vmem>>, vector<2x128xf32>
    %1 = vector.extract_strided_slice %0 {offsets = [0, 0], sizes = [1, 8], strides = [1, 1]} : vector<2x128xf32> to vector<1x8xf32>
    %2 = vector.extract_strided_slice %0 {offsets = [1, 0], sizes = [1, 8], strides = [1, 1]} : vector<2x128xf32> to vector<1x8xf32>
    %c0_1 = arith.constant 0 : index
    %c0_2 = arith.constant 0 : index
    %3 = vector.load %arg2[%c0_1, %c0_2] : memref<128x8xf32, #tpu.memory_space<vmem>>, vector<128x8xf32>
    %4 = vector.broadcast %1 : vector<1x8xf32> to vector<128x8xf32>
    %5 = arith.mulf %3, %4 : vector<128x8xf32>
    %6 = vector.broadcast %2 : vector<1x8xf32> to vector<128x8xf32>
    %7 = arith.addf %5, %6 : vector<128x8xf32>
    %cst = arith.constant 0.000000e+00 : f32
    %8 = vector.broadcast %cst : f32 to vector<128x8xf32>
    %9 = arith.maximumf %7, %8 : vector<128x8xf32>
    %c0_3 = arith.constant 0 : index
    %c0_4 = arith.constant 0 : index
    %10 = vector.load %arg3[%c0_3, %c0_4] : memref<128x8xf32, #tpu.memory_space<vmem>>, vector<128x8xf32>
    tpu.vector_store %arg3[%c0_3, %c0_4], %9 {strides = array<i32>} : memref<128x8xf32, #tpu.memory_space<vmem>>, vector<128x8xf32>,
    return
  }
  func.func @transform_0(%arg0: i32) -> (i32, i32) {
    %c0_i32 = arith.constant 0 : i32
    %c0_i32_0 = arith.constant 0 : i32
    %c0_i32_1 = arith.constant 0 : i32
    return %c0_i32, %c0_i32_0 : i32, i32
  }
  func.func @transform_1(%arg0: i32) -> (i32, i32) {
    %c0_i32 = arith.constant 0 : i32
    %c0_i32_0 = arith.constant 0 : i32
    return %arg0, %c0_i32 : i32, i32
  }
  func.func @transform_2(%arg0: i32) -> (i32, i32) {
    %c0_i32 = arith.constant 0 : i32
    %c0_i32_0 = arith.constant 0 : i32
    return %arg0, %c0_i32 : i32, i32
  }
}

module attributes {stable_mosaic.version = 11 : i64} {
  func.func @_conv_stats_kernel(%arg0: i32, %arg1: memref<128x36xbf16, #tpu.memory_space<vmem>>, %arg2: memref<36x128xbf16, #tpu.memory_space<vmem>>, %arg3: memref<1x128xf32, #tpu.memory_space<vmem>>, %arg4: memref<1x128xf32, #tpu.memory_space<vmem>>, %arg5: memref<128x8xf32, #tpu.memory_space<vmem>>, %arg6: memref<2x128xf32, #tpu.memory_space<vmem>>, %arg7: memref<1x128xf32, #tpu.memory_space<vmem>>, %arg8: memref<1x128xf32, #tpu.memory_space<vmem>>) attributes {dimension_semantics = [#tpu.dimension_semantics<arbitrary>], iteration_bounds = array<i64: 1>, scalar_prefetch = 0 : i64, scratch_operands = 2 : i64, tpu.core_type = #tpu.core_type<tc>, window_params = [{transform_indices = @transform_0, window_bounds = array<i64: 128, 36>}, {pipeline_mode = #tpu.pipeline_mode<synchronous>, transform_indices = @transform_1, window_bounds = array<i64: 36, 128>}, {pipeline_mode = #tpu.pipeline_mode<synchronous>, transform_indices = @transform_2, window_bounds = array<i64: 1, 128>}, {pipeline_mode = #tpu.pipeline_mode<synchronous>, transform_indices = @transform_3, window_bounds = array<i64: 1, 128>}, {transform_indices = @transform_4, window_bounds = array<i64: 128, 8>}, {pipeline_mode = #tpu.pipeline_mode<synchronous>, transform_indices = @transform_5, window_bounds = array<i64: 2, 128>}]} {
    %c0_i32 = arith.constant 0 : i32
    %0 = arith.cmpi eq, %arg0, %c0_i32 : i32
    %1 = arith.extui %0 : i1 to i32
    %c0_i32_0 = arith.constant 0 : i32
    %2 = arith.cmpi ne, %1, %c0_i32_0 : i32
    scf.if %2 {
      %cst_18 = arith.constant 0.000000e+00 : f32
      %22 = vector.broadcast %cst_18 : f32 to vector<1x128xf32>
      %c0_19 = arith.constant 0 : index
      %c0_20 = arith.constant 0 : index
      %23 = vector.load %arg7[%c0_19, %c0_20] : memref<1x128xf32, #tpu.memory_space<vmem>>, vector<1x128xf32>
      tpu.vector_store %arg7[%c0_19, %c0_20], %22 {strides = array<i32>} : memref<1x128xf32, #tpu.memory_space<vmem>>, vector<1x128xf32>,
      %cst_21 = arith.constant 0.000000e+00 : f32
      %24 = vector.broadcast %cst_21 : f32 to vector<1x128xf32>
      %c0_22 = arith.constant 0 : index
      %c0_23 = arith.constant 0 : index
      %25 = vector.load %arg8[%c0_22, %c0_23] : memref<1x128xf32, #tpu.memory_space<vmem>>, vector<1x128xf32>
      tpu.vector_store %arg8[%c0_22, %c0_23], %24 {strides = array<i32>} : memref<1x128xf32, #tpu.memory_space<vmem>>, vector<1x128xf32>,
    } else {
    }
    %c0 = arith.constant 0 : index
    %c0_1 = arith.constant 0 : index
    %3 = vector.load %arg1[%c0, %c0_1] : memref<128x36xbf16, #tpu.memory_space<vmem>>, vector<128x36xbf16>
    %c0_2 = arith.constant 0 : index
    %c0_3 = arith.constant 0 : index
    %4 = vector.load %arg2[%c0_2, %c0_3] : memref<36x128xbf16, #tpu.memory_space<vmem>>, vector<36x128xbf16>
    %cst = arith.constant dense<0.000000e+00> : vector<128x128xf32>
    %5 = tpu.matmul %3, %4, %cst {dimension_numbers = #tpu.dot_dimension_numbers<[1], [0], [0], [1], [0, 0, 1, 1], [], []>} : vector<128x36xbf16>, vector<36x128xbf16>, vector<128x128xf32> -> vector<128x128xf32>
    %c0_4 = arith.constant 0 : index
    %c0_5 = arith.constant 0 : index
    %6 = vector.load %arg7[%c0_4, %c0_5] : memref<1x128xf32, #tpu.memory_space<vmem>>, vector<1x128xf32>
    %cst_6 = arith.constant dense<0.000000e+00> : vector<128xf32>
    %7 = vector.multi_reduction <add>, %5, %cst_6 [0] : vector<128x128xf32> to vector<128xf32>
    %8 = vector.shape_cast %7 : vector<128xf32> to vector<1x128xf32>
    %9 = arith.addf %6, %8 : vector<1x128xf32>
    %c0_7 = arith.constant 0 : index
    %c0_8 = arith.constant 0 : index
    %10 = vector.load %arg7[%c0_7, %c0_8] : memref<1x128xf32, #tpu.memory_space<vmem>>, vector<1x128xf32>
    tpu.vector_store %arg7[%c0_7, %c0_8], %9 {strides = array<i32>} : memref<1x128xf32, #tpu.memory_space<vmem>>, vector<1x128xf32>,
    %c0_9 = arith.constant 0 : index
    %c0_10 = arith.constant 0 : index
    %11 = vector.load %arg8[%c0_9, %c0_10] : memref<1x128xf32, #tpu.memory_space<vmem>>, vector<1x128xf32>
    %12 = arith.mulf %5, %5 : vector<128x128xf32>
    %cst_11 = arith.constant dense<0.000000e+00> : vector<128xf32>
    %13 = vector.multi_reduction <add>, %12, %cst_11 [0] : vector<128x128xf32> to vector<128xf32>
    %14 = vector.shape_cast %13 : vector<128xf32> to vector<1x128xf32>
    %15 = arith.addf %11, %14 : vector<1x128xf32>
    %c0_12 = arith.constant 0 : index
    %c0_13 = arith.constant 0 : index
    %16 = vector.load %arg8[%c0_12, %c0_13] : memref<1x128xf32, #tpu.memory_space<vmem>>, vector<1x128xf32>
    tpu.vector_store %arg8[%c0_12, %c0_13], %15 {strides = array<i32>} : memref<1x128xf32, #tpu.memory_space<vmem>>, vector<1x128xf32>,
    %17 = vector.extract_strided_slice %5 {offsets = [0, 0], sizes = [128, 8], strides = [1, 1]} : vector<128x128xf32> to vector<128x8xf32>
    %c0_14 = arith.constant 0 : index
    %c0_15 = arith.constant 0 : index
    %18 = vector.load %arg5[%c0_14, %c0_15] : memref<128x8xf32, #tpu.memory_space<vmem>>, vector<128x8xf32>
    tpu.vector_store %arg5[%c0_14, %c0_15], %17 {strides = array<i32>} : memref<128x8xf32, #tpu.memory_space<vmem>>, vector<128x8xf32>,
    %c0_i32_16 = arith.constant 0 : i32
    %19 = arith.cmpi eq, %arg0, %c0_i32_16 : i32
    %20 = arith.extui %19 : i1 to i32
    %c0_i32_17 = arith.constant 0 : i32
    %21 = arith.cmpi ne, %20, %c0_i32_17 : i32
    scf.if %21 {
      %c0_18 = arith.constant 0 : index
      %c0_19 = arith.constant 0 : index
      %22 = vector.load %arg7[%c0_18, %c0_19] : memref<1x128xf32, #tpu.memory_space<vmem>>, vector<1x128xf32>
      %cst_20 = arith.constant 7.812500e-03 : f32
      %23 = vector.broadcast %cst_20 : f32 to vector<1x128xf32>
      %24 = arith.mulf %22, %23 : vector<1x128xf32>
      %c0_21 = arith.constant 0 : index
      %c0_22 = arith.constant 0 : index
      %25 = vector.load %arg8[%c0_21, %c0_22] : memref<1x128xf32, #tpu.memory_space<vmem>>, vector<1x128xf32>
      %cst_23 = arith.constant 7.812500e-03 : f32
      %26 = vector.broadcast %cst_23 : f32 to vector<1x128xf32>
      %27 = arith.mulf %25, %26 : vector<1x128xf32>
      %28 = arith.mulf %24, %24 : vector<1x128xf32>
      %29 = arith.subf %27, %28 : vector<1x128xf32>
      %c0_24 = arith.constant 0 : index
      %c0_25 = arith.constant 0 : index
      %30 = vector.load %arg3[%c0_24, %c0_25] : memref<1x128xf32, #tpu.memory_space<vmem>>, vector<1x128xf32>
      %cst_26 = arith.constant 9.99999974E-6 : f32
      %31 = vector.broadcast %cst_26 : f32 to vector<1x128xf32>
      %32 = arith.addf %29, %31 : vector<1x128xf32>
      %33 = math.rsqrt %32 : vector<1x128xf32>
      %34 = arith.mulf %30, %33 : vector<1x128xf32>
      %c0_27 = arith.constant 0 : index
      %c0_28 = arith.constant 0 : index
      %35 = vector.load %arg4[%c0_27, %c0_28] : memref<1x128xf32, #tpu.memory_space<vmem>>, vector<1x128xf32>
      %36 = arith.mulf %24, %34 : vector<1x128xf32>
      %37 = arith.subf %35, %36 : vector<1x128xf32>
      %38 = tpu.concatenate %34, %37 in 0 : vector<1x128xf32>, vector<1x128xf32> -> vector<2x128xf32>
      %c0_29 = arith.constant 0 : index
      %c0_30 = arith.constant 0 : index
      %39 = vector.load %arg6[%c0_29, %c0_30] : memref<2x128xf32, #tpu.memory_space<vmem>>, vector<2x128xf32>
      tpu.vector_store %arg6[%c0_29, %c0_30], %38 {strides = array<i32>} : memref<2x128xf32, #tpu.memory_space<vmem>>, vector<2x128xf32>,
    } else {
    }
    return
  }
  func.func @transform_0(%arg0: i32) -> (i32, i32) {
    %c0_i32 = arith.constant 0 : i32
    %c0_i32_0 = arith.constant 0 : i32
    return %arg0, %c0_i32 : i32, i32
  }
  func.func @transform_1(%arg0: i32) -> (i32, i32) {
    %c0_i32 = arith.constant 0 : i32
    %c0_i32_0 = arith.constant 0 : i32
    %c0_i32_1 = arith.constant 0 : i32
    return %c0_i32, %c0_i32_0 : i32, i32
  }
  func.func @transform_2(%arg0: i32) -> (i32, i32) {
    %c0_i32 = arith.constant 0 : i32
    %c0_i32_0 = arith.constant 0 : i32
    %c0_i32_1 = arith.constant 0 : i32
    return %c0_i32, %c0_i32_0 : i32, i32
  }
  func.func @transform_3(%arg0: i32) -> (i32, i32) {
    %c0_i32 = arith.constant 0 : i32
    %c0_i32_0 = arith.constant 0 : i32
    %c0_i32_1 = arith.constant 0 : i32
    return %c0_i32, %c0_i32_0 : i32, i32
  }
  func.func @transform_4(%arg0: i32) -> (i32, i32) {
    %c0_i32 = arith.constant 0 : i32
    %c0_i32_0 = arith.constant 0 : i32
    return %arg0, %c0_i32 : i32, i32
  }
  func.func @transform_5(%arg0: i32) -> (i32, i32) {
    %c0_i32 = arith.constant 0 : i32
    %c0_i32_0 = arith.constant 0 : i32
    %c0_i32_1 = arith.constant 0 : i32
    return %c0_i32, %c0_i32_0 : i32, i32
  }
}

</mosaic_0001>

<bundles_post_ra>
// kernel: block_forward.3
= control target key start
LH: loop header
LB: loop body
LE: loop exit
PB: predicated region body
PF: predicated region fallthrough
CT: control target
= control target key end

     0   :  { %v28_v0 = vlaneseq  ;;  %vm84_vm0 = vcmask 64512   ;;  %s235_s0 = inlined_call_operand.vmem [shape: f32[2,128], index: 0, kind: input, shape index: {}]   ;;  %s236_s1 = inlined_call_operand.vmem [shape: f32[128,8], index: 1, kind: input, shape index: {}, may-alias: {1,2}]   ;;  %s237_s2 = inlined_call_operand.vmem [shape: f32[128,8], index: 2, kind: output, shape index: {}, may-alias: {1,2}]  }
   0x1   :  { %v11_v2 = vld [vmem:[%s235_s0] sm:$0x3]  ;;  %v13_v6 = vld [vmem:[%s236_s1 + $0x8] sm:$0xff]  ;;  %v14_v7 = vld [vmem:[%s236_s1 + $0x10] sm:$0xff] }
   0x2   :  { %v29_v1 = vshrl.u32 %v28_v0, 7  ;;  %v12_v3 = vld [vmem:[%s236_s1] sm:$0xff]  ;;  %v15_v8 = vld [vmem:[%s236_s1 + $0x18] sm:$0xff]  ;;  %v17_v12 = vld [vmem:[%s236_s1 + $0x28] sm:$0xff] }
   0x3   :  { %v16_v9 = vld [vmem:[%s236_s1 + $0x20] sm:$0xff]  ;;  %v18_v13 = vld [vmem:[%s236_s1 + $0x30] sm:$0xff]  ;;  %v19_v14 = vld [vmem:[%s236_s1 + $0x38] sm:$0xff] }
   0x4   :  { %v30_v4 = vsub.s32 0, %v29_v1  ;;  %v50_v5 = vsub.s32 1, %v29_v1  ;;  %v20_v27 = vld [vmem:[%s236_s1 + $0x40] sm:$0xff]  ;;  %v21_v28 = vld [vmem:[%s236_s1 + $0x48] sm:$0xff]  ;;  %v22_v29 = vld [vmem:[%s236_s1 + $0x50] sm:$0xff] }
   0x5   :  { %v23_v34 = vld [vmem:[%s236_s1 + $0x58] sm:$0xff]  ;;  %v24_v35 = vld [vmem:[%s236_s1 + $0x60] sm:$0xff]  ;;  %v25_v36 = vld [vmem:[%s236_s1 + $0x68] sm:$0xff] }
   0x6   :  { %v31_v10 = vrot.slane %v11_v2, %v30_v4  ;;  %v51_v11 = vrot.slane %v11_v2, %v50_v5  ;;  %v26_v41 = vld [vmem:[%s236_s1 + $0x70] sm:$0xff]  ;;  %v27_v42 = vld [vmem:[%s236_s1 + $0x78] sm:$0xff] }
   0x8   :  { %v32_v15 = vmul.f32 %v31_v10, %v12_v3  ;;  %v33_v16 = vmul.f32 %v31_v10, %v13_v6  ;;  %v34_v17 = vmul.f32 %v31_v10, %v14_v7  ;;  %v35_v18 = vmul.f32 %v31_v10, %v15_v8 }
   0x9   :  { %v36_v19 = vmul.f32 %v31_v10, %v16_v9  ;;  %v37_v20 = vmul.f32 %v31_v10, %v17_v12  ;;  %v38_v21 = vmul.f32 %v31_v10, %v18_v13  ;;  %v39_v22 = vmul.f32 %v31_v10, %v19_v14 }
   0xa   :  { %v52_v23 = vadd.f32 %v51_v11, %v32_v15  ;;  %v53_v24 = vadd.f32 %v51_v11, %v33_v16  ;;  %v54_v25 = vadd.f32 %v51_v11, %v34_v17  ;;  %v55_v26 = vadd.f32 %v51_v11, %v35_v18 }
   0xb   :  { %v56_v30 = vadd.f32 %v51_v11, %v36_v19  ;;  %v57_v31 = vadd.f32 %v51_v11, %v37_v20  ;;  %v58_v32 = vadd.f32 %v51_v11, %v38_v21  ;;  %v59_v33 = vadd.f32 %v51_v11, %v39_v22 }
   0xc   :  { %v68_v37 = vmax.f32 %v52_v23, 0.0  ;;  %v69_v38 = vmax.f32 %v53_v24, 0.0  ;;  %v70_v39 = vmax.f32 %v54_v25, 0.0  ;;  %v71_v40 = vmax.f32 %v55_v26, 0.0 }
   0xd   :  { %v72_v43 = vmax.f32 %v56_v30, 0.0  ;;  %v73_v44 = vmax.f32 %v57_v31, 0.0  ;;  %v74_v45 = vmax.f32 %v58_v32, 0.0  ;;  %v75_v46 = vmax.f32 %v59_v33, 0.0 }
   0xe   :  { %85 = vst.msk [vmem:[%s237_s2] sm:$0xff] %vm84_vm0, %v68_v37  ;;  %86 = vst.msk [vmem:[%s237_s2 + $0x8] sm:$0xff] %vm84_vm0, %v69_v38  ;;  %v40_v47 = vmul.f32 %v31_v10, %v20_v27  ;;  %v41_v48 = vmul.f32 %v31_v10, %v21_v28  ;;  %v42_v49 = vmul.f32 %v31_v10, %v22_v29 }
   0xf   :  { %87 = vst.msk [vmem:[%s237_s2 + $0x10] sm:$0xff] %vm84_vm0, %v70_v39  ;;  %88 = vst.msk [vmem:[%s237_s2 + $0x18] sm:$0xff] %vm84_vm0, %v71_v40  ;;  %v43_v50 = vmul.f32 %v31_v10, %v23_v34  ;;  %v44_v51 = vmul.f32 %v31_v10, %v24_v35  ;;  %v45_v52 = vmul.f32 %v31_v10, %v25_v36 }
  0x10   :  { %89 = vst.msk [vmem:[%s237_s2 + $0x20] sm:$0xff] %vm84_vm0, %v72_v43  ;;  %90 = vst.msk [vmem:[%s237_s2 + $0x28] sm:$0xff] %vm84_vm0, %v73_v44  ;;  %v46_v53 = vmul.f32 %v31_v10, %v26_v41  ;;  %v47_v54 = vmul.f32 %v31_v10, %v27_v42  ;;  %v60_v55 = vadd.f32 %v51_v11, %v40_v47 }
  0x11   :  { %91 = vst.msk [vmem:[%s237_s2 + $0x30] sm:$0xff] %vm84_vm0, %v74_v45  ;;  %92 = vst.msk [vmem:[%s237_s2 + $0x38] sm:$0xff] %vm84_vm0, %v75_v46  ;;  %v61_v56 = vadd.f32 %v51_v11, %v41_v48  ;;  %v62_v57 = vadd.f32 %v51_v11, %v42_v49  ;;  %v63_v58 = vadd.f32 %v51_v11, %v43_v50 }
  0x12   :  { %v64_v59 = vadd.f32 %v51_v11, %v44_v51  ;;  %v65_v60 = vadd.f32 %v51_v11, %v45_v52  ;;  %v66_v61 = vadd.f32 %v51_v11, %v46_v53  ;;  %v67_v62 = vadd.f32 %v51_v11, %v47_v54 }
  0x13   :  { %v76_v63 = vmax.f32 %v60_v55, 0.0  ;;  %v77_v0 = vmax.f32 %v61_v56, 0.0  ;;  %v78_v1 = vmax.f32 %v62_v57, 0.0  ;;  %v79_v2 = vmax.f32 %v63_v58, 0.0 }
  0x14   :  { %v80_v3 = vmax.f32 %v64_v59, 0.0  ;;  %v81_v4 = vmax.f32 %v65_v60, 0.0  ;;  %v82_v5 = vmax.f32 %v66_v61, 0.0  ;;  %v83_v6 = vmax.f32 %v67_v62, 0.0 }
  0x15   :  { %93 = vst.msk [vmem:[%s237_s2 + $0x40] sm:$0xff] %vm84_vm0, %v76_v63  ;;  %94 = vst.msk [vmem:[%s237_s2 + $0x48] sm:$0xff] %vm84_vm0, %v77_v0 }
  0x16   :  { %95 = vst.msk [vmem:[%s237_s2 + $0x50] sm:$0xff] %vm84_vm0, %v78_v1  ;;  %96 = vst.msk [vmem:[%s237_s2 + $0x58] sm:$0xff] %vm84_vm0, %v79_v2 }
  0x17   :  { %97 = vst.msk [vmem:[%s237_s2 + $0x60] sm:$0xff] %vm84_vm0, %v80_v3  ;;  %98 = vst.msk [vmem:[%s237_s2 + $0x68] sm:$0xff] %vm84_vm0, %v81_v4 }
  0x18   :  { %99 = vst.msk [vmem:[%s237_s2 + $0x70] sm:$0xff] %vm84_vm0, %v82_v5  ;;  %100 = vst.msk [vmem:[%s237_s2 + $0x78] sm:$0xff] %vm84_vm0, %v83_v6 }

// kernel: block_forward.2
= control target key start
LH: loop header
LB: loop body
LE: loop exit
PB: predicated region body
PF: predicated region fallthrough
CT: control target
= control target key end

     0   :  { %vm102_vm0 = vcmask 293888   ;;  %vm127_vm1 = vcmask 1041408   ;;  %v416_v12 = vmov 0.0   ;;  %vm292_vm2 = vcmask 64512   ;;  %s561_s1 = inlined_call_operand.vmem [shape: bf16[36,128], index: 1, kind: input, shape index: {}]   ;;  %s562_s0 = inlined_call_operand.vmem [shape: bf16[128,36], index: 0, kind: input, shape index: {}]   ;;  %s563_s4 = inlined_call_operand.vmem [shape: f32[128,8], index: 4, kind: output, shape index: {0}]   ;;  %s564_s2 = inlined_call_operand.vmem [shape: f32[1,128], index: 2, kind: input, shape index: {}]   ;;  %s565_s3 = inlined_call_operand.vmem [shape: f32[1,128], index: 3, kind: input, shape index: {}]   ;;  %s566_s5 = inlined_call_operand.vmem [shape: f32[2,128], index: 5, kind: output, shape index: {1}]  }
   0x1   :  { %v403_v0 = vld [vmem:[%s561_s1] sm:$0xff]   ;;  %v404_v1 = vld [vmem:[%s561_s1 + $0x8] sm:$0xff]   ;;  %v405_v2 = vld [vmem:[%s561_s1 + $0x10] ss:$0 sps:$4 sm:$0x33]   ;;  %vm331_vm3 = vcmask 1040384  }
   0x2   :  { %372 = vmatprep.subr.bf16.mxu0 %v403_v0  ;;  %v406_v3 = vld [vmem:[%s562_s0] sm:$0xff]   ;;  %394 = vmatprep.subr.bf16.mxu1 %v403_v0  ;;  %v129_v5 = vsel %vm127_vm1, %v405_v2, 0  ;;  %v407_v6 = vld [vmem:[%s562_s0 + $0x8] sm:$0xff]   ;;  %v408_v8 = vld [vmem:[%s562_s0 + $0x10] sm:$0xff]   ;;  %24 = vst [vmem:[#allocation2] sm:$0x1] %v416_v12 }
   0x3   :  { %373 = vmatpush3.bf16.msra.mxu0 %v403_v0  ;;  %397 = vmatpush3.bf16.msra.mxu1 %v403_v0  ;;  %v410_v4 = vld [vmem:[%s562_s0 + $0x20] sm:$0xff]   ;;  %v411_v7 = vld [vmem:[%s562_s0 + $0x28] sm:$0xff]   ;;  %v412_v9 = vld [vmem:[%s562_s0 + $0x30] sm:$0xff]   ;;  %25 = vst [vmem:[#allocation3] sm:$0x1] %v416_v12 }
   0x4   :  { %374 = vmatprep.subr.bf16.mxu0 %v404_v1  ;;  %378 = vmatprep.mubr.msk.bf16.mxu0 %vm102_vm0, %v406_v3  ;;  %v409_v10 = vld [vmem:[%s562_s0 + $0x18] sm:$0xff]  }
   0x5   :  { %395 = vmatprep.subr.bf16.mxu1 %v404_v1  ;;  %386 = vmatprep.mubr.msk.bf16.mxu1 %vm102_vm0, %v410_v4  ;;  %v413_v11 = vld [vmem:[%s562_s0 + $0x38] sm:$0xff]  }
   0x7   :  { %375 = vmatpush3.bf16.msra.mxu0 %v404_v1  ;;  %398 = vmatpush3.bf16.msra.mxu1 %v404_v1 }
   0x8   :  { %400 = vmatprep.subr.msk.bf16.mxu0 %vm127_vm1, %v405_v2  ;;  %401 = vmatprep.subr.msk.bf16.mxu1 %vm127_vm1, %v405_v2 }
   0xb   :  { %377 = vmatpush3.bf16.msra.mxu0 %v129_v5  ;;  %399 = vmatpush3.bf16.msra.mxu1 %v129_v5 }
   0xe   :  { %379 = vmatmul.mubr.msk.bf16.vlgmr.msra.gmra.mrb[0].mxu0 %vm102_vm0, %v407_v6  ;;  %387 = vmatmul.mubr.msk.bf16.vlgmr.msra.gmra.mrb[0].mxu1 %vm102_vm0, %v411_v7 }
   0xf   :  { %382 = vmatprep.mubr.msk.bf16.mxu0 %vm102_vm0, %v408_v8  ;;  %390 = vmatprep.mubr.msk.bf16.mxu1 %vm102_vm0, %v412_v9 }
  0x16   :  { %383 = vmatmul.mubr.msk.bf16.gmra.mrb[4].mxu0 %vm102_vm0, %v409_v10  ;;  %391 = vmatmul.mubr.msk.bf16.gmra.mrb[4].mxu1 %vm102_vm0, %v413_v11 }
  0xe1   :  { %v380_v13 = vpop.f32.mrb[0].mxu0  ;;  %v388_v14 = vpop.f32.mrb[0].mxu1 }
  0xe2   :  { %295 = vst.msk [vmem:[%s563_s4 + $0x10] sm:$0xff] %vm292_vm2, %v380_v13  ;;  %v165_v15 = vpop.f32.mrb[1].mxu0  ;;  %303 = vst.msk [vmem:[%s563_s4 + $0x50] sm:$0xff] %vm292_vm2, %v388_v14  ;;  %v197_v16 = vpop.f32.mrb[1].mxu1  ;;  %v255_v24 = vmul.f32 %v380_v13, %v380_v13  ;;  %v263_v56 = vmul.f32 %v388_v14, %v388_v14 }
  0xe3   :  { %293 = vst.msk [vmem:[%s563_s4] sm:$0xff] %vm292_vm2, %v165_v15  ;;  %v381_v17 = vpop.f32.mrb[2].mxu0  ;;  %301 = vst.msk [vmem:[%s563_s4 + $0x40] sm:$0xff] %vm292_vm2, %v197_v16  ;;  %v389_v18 = vpop.f32.mrb[2].mxu1  ;;  %v253_v21 = vmul.f32 %v165_v15, %v165_v15  ;;  %v261_v50 = vmul.f32 %v197_v16, %v197_v16 }
  0xe4   :  { %296 = vst.msk [vmem:[%s563_s4 + $0x18] sm:$0xff] %vm292_vm2, %v381_v17  ;;  %v168_v19 = vpop.f32.mrb[3].mxu0  ;;  %304 = vst.msk [vmem:[%s563_s4 + $0x58] sm:$0xff] %vm292_vm2, %v389_v18  ;;  %v200_v20 = vpop.f32.mrb[3].mxu1  ;;  %v256_v27 = vmul.f32 %v381_v17, %v381_v17  ;;  %v264_v59 = vmul.f32 %v389_v18, %v389_v18 }
  0xe5   :  { %v229_v22 = vadd.f32 %v168_v19, %v165_v15  ;;  %v254_v23 = vmul.f32 %v168_v19, %v168_v19  ;;  %294 = vst.msk [vmem:[%s563_s4 + $0x8] sm:$0xff] %vm292_vm2, %v168_v19  ;;  %302 = vst.msk [vmem:[%s563_s4 + $0x48] sm:$0xff] %vm292_vm2, %v200_v20  ;;  %v262_v55 = vmul.f32 %v200_v20, %v200_v20 }
  0xe7   :  { %v230_v25 = vadd.f32 %v380_v13, %v229_v22  ;;  %v269_v26 = vadd.f32 %v254_v23, %v253_v21  ;;  %v252_v23 = vld [vmem:[#allocation3] sm:$0x1] }
  0xe9   :  { %v270_v28 = vadd.f32 %v269_v26, %v255_v24  ;;  %v384_v29 = vpop.f32.mrb[4].mxu0  ;;  %v231_v30 = vadd.f32 %v381_v17, %v230_v25  ;;  %v392_v31 = vpop.f32.mrb[4].mxu1 }
  0xea   :  { %299 = vst.msk [vmem:[%s563_s4 + $0x30] sm:$0xff] %vm292_vm2, %v384_v29  ;;  %v181_v32 = vpop.f32.mrb[5].mxu0  ;;  %307 = vst.msk [vmem:[%s563_s4 + $0x70] sm:$0xff] %vm292_vm2, %v392_v31  ;;  %v213_v33 = vpop.f32.mrb[5].mxu1  ;;  %v259_v44 = vmul.f32 %v384_v29, %v384_v29  ;;  %v267_v4 = vmul.f32 %v392_v31, %v392_v31 }
  0xeb   :  { %v232_v34 = vadd.f32 %v231_v30, %v181_v32  ;;  %v257_v35 = vmul.f32 %v181_v32, %v181_v32  ;;  %v271_v36 = vadd.f32 %v270_v28, %v256_v27  ;;  %297 = vst.msk [vmem:[%s563_s4 + $0x20] sm:$0xff] %vm292_vm2, %v181_v32  ;;  %v385_v37 = vpop.f32.mrb[6].mxu0  ;;  %305 = vst.msk [vmem:[%s563_s4 + $0x60] sm:$0xff] %vm292_vm2, %v213_v33  ;;  %v393_v38 = vpop.f32.mrb[6].mxu1 }
  0xec   :  { %300 = vst.msk [vmem:[%s563_s4 + $0x38] sm:$0xff] %vm292_vm2, %v385_v37  ;;  %v184_v39 = vpop.f32.mrb[7].mxu0  ;;  %308 = vst.msk [vmem:[%s563_s4 + $0x78] sm:$0xff] %vm292_vm2, %v393_v38  ;;  %v216_v40 = vpop.f32.mrb[7].mxu1  ;;  %v260_v47 = vmul.f32 %v385_v37, %v385_v37  ;;  %v265_v62 = vmul.f32 %v213_v33, %v213_v33  ;;  %v268_v7 = vmul.f32 %v393_v38, %v393_v38 }
  0xed   :  { %v272_v41 = vadd.f32 %v271_v36, %v257_v35  ;;  %v233_v42 = vadd.f32 %v232_v34, %v184_v39  ;;  %v258_v43 = vmul.f32 %v184_v39, %v184_v39  ;;  %298 = vst.msk [vmem:[%s563_s4 + $0x28] sm:$0xff] %vm292_vm2, %v184_v39  ;;  %306 = vst.msk [vmem:[%s563_s4 + $0x68] sm:$0xff] %vm292_vm2, %v216_v40  ;;  %v326_v34 = vlaneseq  ;;  %v318_v35 = vld [vmem:[%s564_s2] sm:$0x1] }
  0xee   :  { %v266_v3 = vmul.f32 %v216_v40, %v216_v40  ;;  %v322_v39 = vld [vmem:[%s565_s3] sm:$0x1] }
  0xef   :  { %v234_v45 = vadd.f32 %v384_v29, %v233_v42  ;;  %v273_v46 = vadd.f32 %v272_v41, %v258_v43  ;;  %v327_v36 = vshrl.u32 %v326_v34, 7 }
  0xf1   :  { %v274_v48 = vadd.f32 %v273_v46, %v259_v44  ;;  %v235_v49 = vadd.f32 %v385_v37, %v234_v45  ;;  %v328_v41 = vsub.s32 0, %v327_v36 }
  0xf3   :  { %v236_v51 = vadd.f32 %v235_v49, %v197_v16  ;;  %v275_v52 = vadd.f32 %v274_v48, %v260_v47 }
  0xf5   :  { %v276_v53 = vadd.f32 %v275_v52, %v261_v50  ;;  %v237_v54 = vadd.f32 %v236_v51, %v200_v20  ;;  %v228_v20 = vld [vmem:[#allocation2] sm:$0x1] }
  0xf7   :  { %v238_v57 = vadd.f32 %v388_v14, %v237_v54  ;;  %v277_v58 = vadd.f32 %v276_v53, %v262_v55 }
  0xf9   :  { %v278_v60 = vadd.f32 %v277_v58, %v263_v56  ;;  %v239_v61 = vadd.f32 %v389_v18, %v238_v57 }
  0xfb   :  { %v240_v63 = vadd.f32 %v239_v61, %v213_v33  ;;  %v279_v0 = vadd.f32 %v278_v60, %v264_v59 }
  0xfd   :  { %v280_v1 = vadd.f32 %v279_v0, %v265_v62  ;;  %v241_v2 = vadd.f32 %v240_v63, %v216_v40 }
  0xff   :  { %v242_v5 = vadd.f32 %v392_v31, %v241_v2  ;;  %v281_v6 = vadd.f32 %v280_v1, %v266_v3 }
 0x101   :  { %v243_v8 = vadd.f32 %v393_v38, %v242_v5  ;;  %v282_v9 = vadd.f32 %v281_v6, %v267_v4 }
 0x103   :  { %v244_v10 = vrot.slane %v243_v8, 4  ;;  %v283_v11 = vadd.f32 %v282_v9, %v268_v7 }
 0x105   :  { %v245_v12 = vadd.f32 %v244_v10, %v243_v8  ;;  %v284_v13 = vrot.slane %v283_v11, 4 }
 0x107   :  { %v246_v14 = vrot.slane %v245_v12, 2  ;;  %v285_v15 = vadd.f32 %v284_v13, %v283_v11 }
 0x109   :  { %v247_v16 = vadd.f32 %v246_v14, %v245_v12  ;;  %v286_v17 = vrot.slane %v285_v15, 2 }
 0x10b   :  { %v248_v18 = vrot.slane %v247_v16, 1  ;;  %v287_v19 = vadd.f32 %v286_v17, %v285_v15 }
 0x10d   :  { %v249_v21 = vadd.f32 %v248_v18, %v247_v16  ;;  %v288_v22 = vrot.slane %v287_v19, 1 }
 0x10f   :  { %v250_v24 = vadd.f32 %v249_v21, %v228_v20  ;;  %v289_v25 = vadd.f32 %v288_v22, %v287_v19 }
 0x111   :  { %251 = vst [vmem:[#allocation2] sm:$0x1] %v250_v24  ;;  %v290_v26 = vadd.f32 %v289_v25, %v252_v23 }
 0x113   :  { %291 = vst [vmem:[#allocation3] sm:$0x1] %v290_v26 }
 0x118   :  { %v312_v27 = vld [vmem:[#allocation2] sm:$0x1] }
 0x119   :  { %v313_v28 = vmul.f32 0.0078125, %v312_v27 }
 0x11a   :  { %v314_v29 = vld [vmem:[#allocation3] sm:$0x1] }
 0x11b   :  { %v315_v30 = vmul.f32 0.0078125, %v314_v29  ;;  %v316_v31 = vmul.f32 %v313_v28, %v313_v28 }
 0x11d   :  { %v317_v32 = vsub.f32 %v315_v30, %v316_v31 }
 0x11f   :  { %v319_v33 = vadd.f32 1e-05, %v317_v32 }
 0x121   :  { %414 = vrsqrt.f32 %v319_v33 }
 0x12b   :  { %v415_v37 = vpop.eup %414 }
 0x12c   :  { %v321_v38 = vmul.f32 %v415_v37, %v318_v35 }
 0x12e   :  { %v323_v40 = vmul.f32 %v321_v38, %v313_v28 }
 0x130   :  { %v324_v42 = vsub.f32 %v322_v39, %v323_v40 }
 0x132   :  { %v329_v43 = vrot.slane %v324_v42, %v328_v41 }
 0x134   :  { %v332_v44 = vsel %vm331_vm3, %v321_v38, %v329_v43 }
 0x135   :  { %333 = vst [vmem:[%s566_s5] sm:$0x3] %v332_v44 }

</bundles_post_ra>
